<compile_context>
chip_gen: v7x
topology: tpu7x:2x2x1
jax: 0.10.0
libtpu: 0.0.40
codegen_flags: <defaults>
</compile_context>

<pallas_src>
import jax
import jax.numpy as jnp
from jax.experimental import pallas as pl
from jax.experimental.pallas import tpu as pltpu


_THRESH = 1.25 ** 2  # A2 threshold


def _make_a2_kernel(block_rows, total_rows, k_blocks):
    """Builds the tiled counting kernel (closes over static tiling params)."""
    pad_rows = (-block_rows) % 8  # only nonzero for tiny (<8 row) inputs

    def kernel(pred_ref, target_ref, out_ref):
        pi = pl.program_id(0)   # parallel (per-core) axis
        ki = pl.program_id(1)   # reduction axis

        @pl.when(ki == 0)
        def _():
            out_ref[...] = jnp.zeros_like(out_ref)

        p = pred_ref[...]
        t = target_ref[...]

        # Global row-id of every element in this block, computed from the
        # UNclamped block id: masks both the ragged last block and any
        # fully-out-of-range blocks introduced by grid rounding.
        b = pi * k_blocks + ki
        rows = b * block_rows + jax.lax.broadcasted_iota(
            jnp.int32, (block_rows, 128), 0)
        in_bounds = rows < total_rows

        valid = jnp.logical_and(t > 0.0, in_bounds)
        # thresh = max(p/t, t/p) < TH, rewritten without divisions.
        # Sign-exact vs. torch (pred <= 0 handled); can differ only by ~1 ulp
        # right at the threshold boundary.
        good = jnp.logical_and(
            valid,
            jnp.logical_and(
                p < _THRESH * t,
                jnp.logical_or(t < _THRESH * p, p < 0.0),
            ),
        )

        vi = valid.astype(jnp.int32)
        gi = good.astype(jnp.int32)
        if pad_rows:
            vi = jnp.pad(vi, ((0, pad_rows), (0, 0)))
            gi = jnp.pad(gi, ((0, pad_rows), (0, 0)))
        # Fold rows into an (8,128) vreg-shaped partial: pure VPU adds in the
        # hot loop; the cross-lane reduction happens once, in the JAX wrapper.
        v = vi.reshape(-1, 8, 128).sum(axis=0)
        g = gi.reshape(-1, 8, 128).sum(axis=0)

        out_ref[0, 0, :, :] += v
        out_ref[0, 1, :, :] += g

    return kernel


def a2_metric(pred, target, *, max_block_rows=1024, n_parallel=2):
    """JAX wrapper reproducing A2.forward(pred, target)."""
    p = pred.reshape(-1).astype(jnp.float32)
    t = target.reshape(-1).astype(jnp.float32)
    n = p.shape[0]

    lane_pad = (-n) % 128
    if lane_pad:
        # TODO(synk): rare fallback copy; common depth-map sizes are already
        # 128-aligned so the hot path is a free reshape (no jnp.pad traffic).
        p = jnp.pad(p, (0, lane_pad))
        t = jnp.pad(t, (0, lane_pad))
    R = (n + lane_pad) // 128
    p2 = p.reshape(R, 128)
    t2 = t.reshape(R, 128)

    # Row-tile size: multiple of 8, <= max_block_rows (~0.5 MiB/block/input).
    if R >= 8:
        TR = min(max_block_rows, (R // 8) * 8)
    else:
        TR = R
    NB = pl.cdiv(R, TR)                 # total row-blocks of real data
    NPAR = min(n_parallel, NB)          # megacore sharding (v7x: 2 TCs)
    KB = pl.cdiv(NB, NPAR)              # reduction steps per parallel index

    kernel = _make_a2_kernel(TR, R, KB)

    def in_map(pi, ki):
        # Clamp fully-OOB blocks (grid rounding) back to the last real block;
        # their contribution is zeroed by the in-kernel row mask.
        return (jnp.minimum(pi * KB + ki, NB - 1), 0)

    cost = pl.CostEstimate(
        flops=8 * n,
        transcendentals=0,
        bytes_accessed=8 * n + NPAR * 2 * 8 * 128 * 4,
    )

    out = pl.pallas_call(
        kernel,
        out_shape=jax.ShapeDtypeStruct((NPAR, 2, 8, 128), jnp.int32),
        grid=(NPAR, KB),
        in_specs=[
            pl.BlockSpec((TR, 128), in_map),
            pl.BlockSpec((TR, 128), in_map),
        ],
        out_specs=pl.BlockSpec((1, 2, 8, 128), lambda pi, ki: (pi, 0, 0, 0)),
        compiler_params=pltpu.CompilerParams(
            dimension_semantics=("parallel", "arbitrary")),
        cost_estimate=cost,
    )(p2, t2)

    counts = out.sum(axis=(0, 2, 3))    # (2,) int32: [num_valid, num_good]
    num_valid = counts[0]
    num_good = counts[1]

    # TODO(synk): PyTorch uses a data-dependent early return + .item(); here the
    # `< 10 -> -1` branch is expressed with jnp.where and stays a device scalar.
    return jnp.where(
        num_valid < 10,
        jnp.float32(-1.0),
        num_good.astype(jnp.float32) / jnp.maximum(num_valid, 1).astype(jnp.float32),
    )


def _reference(pred, target):
    """Pure-JAX reference matching the PyTorch A2 semantics."""
    valid = target > 0
    num = int(jnp.sum(valid))
    if num < 10:
        return -1.0
    pv = pred[valid]
    tv = target[valid]
    thresh = jnp.maximum(pv / tv, tv / pv)
    return float(jnp.mean((thresh < 1.25 ** 2).astype(jnp.float32)))


if __name__ == "__main__":
    key = jax.random.PRNGKey(0)
    k1, k2, k3 = jax.random.split(key, 3)

    B, C, H, W = 2, 4, 16, 16
    pred = jax.random.uniform(k1, (B, C, H, W), jnp.float32, 0.5, 2.0)
    depth = jax.random.uniform(k2, (B, C, H, W), jnp.float32, 0.5, 2.0)
    # ~70% of pixels valid (target > 0), rest set to 0.
    valid_mask = jax.random.uniform(k3, (B, C, H, W)) < 0.7
    target = jnp.where(valid_mask, depth, 0.0)

    result = a2_metric(pred, target)
    result = jax.block_until_ready(result)

    ref = _reference(pred, target)
    assert abs(float(result) - ref) < 1e-5, (float(result), ref)

    print("KERNEL_OK")
</pallas_src>

<mosaic_0001>
module attributes {stable_mosaic.version = 11 : i64} {
  func.func @kernel(%arg0: i32, %arg1: i32, %arg2: memref<16x128xf32, #tpu.memory_space<vmem>>, %arg3: memref<16x128xf32, #tpu.memory_space<vmem>>, %arg4: memref<1x2x8x128xi32, #tpu.memory_space<vmem>>) attributes {dimension_semantics = [#tpu.dimension_semantics<parallel>, #tpu.dimension_semantics<arbitrary>], iteration_bounds = array<i64: 1, 1>, scalar_prefetch = 0 : i64, scratch_operands = 0 : i64, tpu.core_type = #tpu.core_type<tc>, window_params = [{transform_indices = @transform_0, window_bounds = array<i64: 16, 128>}, {transform_indices = @transform_1, window_bounds = array<i64: 16, 128>}, {transform_indices = @transform_2, window_bounds = array<i64: 1, 2, 8, 128>}]} {
    %c0_i32 = arith.constant 0 : i32
    %0 = arith.cmpi eq, %arg1, %c0_i32 : i32
    %1 = arith.extui %0 : i1 to i32
    %c0_i32_0 = arith.constant 0 : i32
    %2 = arith.cmpi ne, %1, %c0_i32_0 : i32
    scf.if %2 {
      %c0_i32_25 = arith.constant 0 : i32
      %45 = vector.broadcast %c0_i32_25 : i32 to vector<1x2x8x128xi32>
      %c0_26 = arith.constant 0 : index
      %c0_27 = arith.constant 0 : index
      %c0_28 = arith.constant 0 : index
      %c0_29 = arith.constant 0 : index
      %46 = vector.load %arg4[%c0_26, %c0_27, %c0_28, %c0_29] : memref<1x2x8x128xi32, #tpu.memory_space<vmem>>, vector<1x2x8x128xi32>
      tpu.vector_store %arg4[%c0_26, %c0_27, %c0_28, %c0_29], %45 {strides = array<i32>} : memref<1x2x8x128xi32, #tpu.memory_space<vmem>>, vector<1x2x8x128xi32>,
    } else {
    }
    %c0 = arith.constant 0 : index
    %c0_1 = arith.constant 0 : index
    %3 = vector.load %arg2[%c0, %c0_1] : memref<16x128xf32, #tpu.memory_space<vmem>>, vector<16x128xf32>
    %c0_2 = arith.constant 0 : index
    %c0_3 = arith.constant 0 : index
    %4 = vector.load %arg3[%c0_2, %c0_3] : memref<16x128xf32, #tpu.memory_space<vmem>>, vector<16x128xf32>
    %c1_i32 = arith.constant 1 : i32
    %5 = arith.muli %arg0, %c1_i32 : i32
    %6 = arith.addi %5, %arg1 : i32
    %c16_i32 = arith.constant 16 : i32
    %7 = arith.muli %6, %c16_i32 : i32
    %8 = tpu.iota {dimensions = array<i32: 0>} : vector<16x128xi32>
    %9 = vector.broadcast %7 : i32 to vector<16x128xi32>
    %10 = arith.addi %9, %8 : vector<16x128xi32>
    %c16_i32_4 = arith.constant 16 : i32
    %11 = vector.broadcast %c16_i32_4 : i32 to vector<16x128xi32>
    %12 = arith.cmpi slt, %10, %11 : vector<16x128xi32>
    %cst = arith.constant 0.000000e+00 : f32
    %13 = vector.broadcast %cst : f32 to vector<16x128xf32>
    %14 = arith.cmpf ogt, %4, %13 : vector<16x128xf32>
    %15 = arith.andi %14, %12 : vector<16x128xi1>
    %cst_5 = arith.constant 1.562500e+00 : f32
    %16 = vector.broadcast %cst_5 : f32 to vector<16x128xf32>
    %17 = arith.mulf %16, %4 : vector<16x128xf32>
    %18 = arith.cmpf olt, %3, %17 : vector<16x128xf32>
    %cst_6 = arith.constant 1.562500e+00 : f32
    %19 = vector.broadcast %cst_6 : f32 to vector<16x128xf32>
    %20 = arith.mulf %19, %3 : vector<16x128xf32>
    %21 = arith.cmpf olt, %4, %20 : vector<16x128xf32>
    %cst_7 = arith.constant 0.000000e+00 : f32
    %22 = vector.broadcast %cst_7 : f32 to vector<16x128xf32>
    %23 = arith.cmpf olt, %3, %22 : vector<16x128xf32>
    %24 = arith.ori %21, %23 : vector<16x128xi1>
    %25 = arith.andi %18, %24 : vector<16x128xi1>
    %26 = arith.andi %15, %25 : vector<16x128xi1>
    %27 = arith.extui %15 : vector<16x128xi1> to vector<16x128xi32>
    %28 = arith.extui %26 : vector<16x128xi1> to vector<16x128xi32>
    %29 = vector.shape_cast %27 : vector<16x128xi32> to vector<2x8x128xi32>
    %cst_8 = arith.constant dense<0> : vector<8x128xi32>
    %30 = vector.multi_reduction <add>, %29, %cst_8 [0] : vector<2x8x128xi32> to vector<8x128xi32>
    %31 = vector.shape_cast %28 : vector<16x128xi32> to vector<2x8x128xi32>
    %cst_9 = arith.constant dense<0> : vector<8x128xi32>
    %32 = vector.multi_reduction <add>, %31, %cst_9 [0] : vector<2x8x128xi32> to vector<8x128xi32>
    %c0_10 = arith.constant 0 : index
    %c0_11 = arith.constant 0 : index
    %c0_12 = arith.constant 0 : index
    %c0_13 = arith.constant 0 : index
    %33 = vector.load %arg4[%c0_10, %c0_11, %c0_12, %c0_13] : memref<1x2x8x128xi32, #tpu.memory_space<vmem>>, vector<1x1x8x128xi32>
    %34 = vector.shape_cast %33 : vector<1x1x8x128xi32> to vector<8x128xi32>
    %35 = arith.addi %34, %30 : vector<8x128xi32>
    %c0_14 = arith.constant 0 : index
    %c0_15 = arith.constant 0 : index
    %c0_16 = arith.constant 0 : index
    %c0_17 = arith.constant 0 : index
    %36 = vector.load %arg4[%c0_14, %c0_15, %c0_16, %c0_17] : memref<1x2x8x128xi32, #tpu.memory_space<vmem>>, vector<1x1x8x128xi32>
    %37 = vector.shape_cast %36 : vector<1x1x8x128xi32> to vector<8x128xi32>
    %38 = vector.shape_cast %35 : vector<8x128xi32> to vector<1x1x8x128xi32>
    tpu.vector_store %arg4[%c0_14, %c0_15, %c0_16, %c0_17], %38 {strides = array<i32>} : memref<1x2x8x128xi32, #tpu.memory_space<vmem>>, vector<1x1x8x128xi32>,
    %c0_18 = arith.constant 0 : index
    %c1 = arith.constant 1 : index
    %c0_19 = arith.constant 0 : index
    %c0_20 = arith.constant 0 : index
    %39 = vector.load %arg4[%c0_18, %c1, %c0_19, %c0_20] : memref<1x2x8x128xi32, #tpu.memory_space<vmem>>, vector<1x1x8x128xi32>
    %40 = vector.shape_cast %39 : vector<1x1x8x128xi32> to vector<8x128xi32>
    %41 = arith.addi %40, %32 : vector<8x128xi32>
    %c0_21 = arith.constant 0 : index
    %c1_22 = arith.constant 1 : index
    %c0_23 = arith.constant 0 : index
    %c0_24 = arith.constant 0 : index
    %42 = vector.load %arg4[%c0_21, %c1_22, %c0_23, %c0_24] : memref<1x2x8x128xi32, #tpu.memory_space<vmem>>, vector<1x1x8x128xi32>
    %43 = vector.shape_cast %42 : vector<1x1x8x128xi32> to vector<8x128xi32>
    %44 = vector.shape_cast %41 : vector<8x128xi32> to vector<1x1x8x128xi32>
    tpu.vector_store %arg4[%c0_21, %c1_22, %c0_23, %c0_24], %44 {strides = array<i32>} : memref<1x2x8x128xi32, #tpu.memory_space<vmem>>, vector<1x1x8x128xi32>,
    return
  }
  func.func @transform_0(%arg0: i32, %arg1: i32) -> (i32, i32) {
    %c1_i32 = arith.constant 1 : i32
    %0 = arith.muli %arg0, %c1_i32 : i32
    %1 = arith.addi %0, %arg1 : i32
    %c0_i32 = arith.constant 0 : i32
    %2 = arith.minsi %1, %c0_i32 : i32
    %c0_i32_0 = arith.constant 0 : i32
    %c0_i32_1 = arith.constant 0 : i32
    return %2, %c0_i32_0 : i32, i32
  }
  func.func @transform_1(%arg0: i32, %arg1: i32) -> (i32, i32) {
    %c1_i32 = arith.constant 1 : i32
    %0 = arith.muli %arg0, %c1_i32 : i32
    %1 = arith.addi %0, %arg1 : i32
    %c0_i32 = arith.constant 0 : i32
    %2 = arith.minsi %1, %c0_i32 : i32
    %c0_i32_0 = arith.constant 0 : i32
    %c0_i32_1 = arith.constant 0 : i32
    return %2, %c0_i32_0 : i32, i32
  }
  func.func @transform_2(%arg0: i32, %arg1: i32) -> (i32, i32, i32, i32) {
    %c0_i32 = arith.constant 0 : i32
    %c0_i32_0 = arith.constant 0 : i32
    %c0_i32_1 = arith.constant 0 : i32
    %c0_i32_2 = arith.constant 0 : i32
    return %arg0, %c0_i32, %c0_i32_0, %c0_i32_1 : i32, i32, i32, i32
  }
}

</mosaic_0001>

<bundles_post_ra>
// kernel: tpu_custom_call.1
= control target key start
LH: loop header
LB: loop body
LE: loop exit
PB: predicated region body
PF: predicated region fallthrough
CT: control target
= control target key end

     0   :  { %7 = vsyncpa [#allocation3], 0  ;;  %s283_s0 = inlined_call_operand.hbm [shape: f32[16,128], index: 0, kind: input, shape index: {}]   ;;  %s284_s1 = inlined_call_operand.hbm [shape: f32[16,128], index: 1, kind: input, shape index: {}]   ;;  %s285_s2 = inlined_call_operand.hbm [shape: s32[1,2,8,128], index: 2, kind: output, shape index: {}]  }
   0x1   :  { %8 = vsyncpa [#allocation6], 0 }
   0x2   :  { %9 = vsyncpa [#allocation4], 0  ;;  %s213_s9 = smov [#allocation2]   ;;  %s141_s13 = scalar_lea.hbm %s283_s0, 256 }
   0x3   :  { %s21_s10 = sshll.u32 %s213_s9, 4  ;;  %p142_p0 = scmp.ne.s32.totalorder %s283_s0, %s141_s13  ;;  %s22_s10 = int_to_ptr.vmem [resolvable:$true] %s21_s10 }
   0x4   :  { %p145_p1 = scmp.lt.u32.totalorder %s141_s13, %s283_s0 }
   0x6   :  { %p147_p2 = pnand %p145_p1, %p142_p0 }
   0x8   :  { %150 = shalt.err (!%p147_p2)
}
   0x9   :  { %s151_s18 = scalar_lea.vmem %s22_s10, 256  ;;  %p156_p4 = scmp.lt.s32.totalorder %s22_s10, %s22_s10 }
   0xa   :  { %p152_p3 = scmp.ne.s32.totalorder %s22_s10, %s151_s18  ;;  %p157_p5 = scmp.lt.s32.totalorder %s151_s18, %s151_s18 }
   0xc   :  { %p158_p6 = por %p157_p5, %p156_p4 }
   0xe   :  { %p159_p7 = pnand %p158_p6, %p152_p3 }
  0x10   :  { %162 = shalt.err (!%p159_p7)
}
  0x11   :  { %s214_s19 = smov 128   ;;  %s215_s20 = smov 8  }
  0x12   :  { %27 = dma.hbm_to_vmem [thread:$0]  %s283_s0, 256, %s22_s10, [#allocation3], %s214_s19, %s214_s19, %s215_s20  }
  0x13   :  { %s216_s23 = smov [#allocation5]   ;;  %s163_s27 = scalar_lea.hbm %s284_s1, 256 }
  0x14   :  { %s39_s24 = sshll.u32 %s216_s23, 4  ;;  %p164_p8 = scmp.ne.s32.totalorder %s284_s1, %s163_s27  ;;  %s40_s24 = int_to_ptr.vmem [resolvable:$true] %s39_s24 }
  0x15   :  { %p167_p9 = scmp.lt.u32.totalorder %s163_s27, %s284_s1 }
  0x17   :  { %p169_p10 = pnand %p167_p9, %p164_p8 }
  0x19   :  { %172 = shalt.err (!%p169_p10)
}
  0x1a   :  { %s173_s4 = scalar_lea.vmem %s40_s24, 256  ;;  %p178_p12 = scmp.lt.s32.totalorder %s40_s24, %s40_s24 }
  0x1b   :  { %p174_p11 = scmp.ne.s32.totalorder %s40_s24, %s173_s4  ;;  %p179_p13 = scmp.lt.s32.totalorder %s173_s4, %s173_s4 }
  0x1d   :  { %p180_p0 = por %p179_p13, %p178_p12 }
  0x1f   :  { %p181_p1 = pnand %p180_p0, %p174_p11 }
  0x21   :  { %184 = shalt.err (!%p181_p1)
}
  0x22   :  { %45 = dma.hbm_to_vmem [thread:$0]  %s284_s1, 256, %s40_s24, [#allocation6], %s214_s19, %s214_s19, %s215_s20  }
  0x23   :  { %207 = dma.done.wait [#allocation3], 256  }
  0x24   :  { %208 = vsyncadd [#allocation3], 4294967040 }
  0x25   :  { %209 = dma.done.wait [#allocation6], 256  }
  0x26   :  { %210 = vsyncadd [#allocation6], 4294967040  ;;  %v68_v0 = vld [vmem:[#allocation5] sm:$0xff]  ;;  %v69_v1 = vld [vmem:[#allocation5 + $0x8] sm:$0xff]  ;;  %v217_v6 = vmov 0   ;;  %s218_s1 = smov [#allocation7]  }
  0x27   :  { %v66_v2 = vld [vmem:[#allocation2] sm:$0xff]  ;;  %vm80_vm0 = vcmp.gt.f32.partialorder %v68_v0, 0.0  ;;  %vm81_vm1 = vcmp.gt.f32.partialorder %v69_v1, 0.0  ;;  %v67_v3 = vld [vmem:[#allocation2 + $0x8] sm:$0xff]  ;;  %v84_v4 = vmul.f32 1.5625, %v68_v0  ;;  %v85_v5 = vmul.f32 1.5625, %v69_v1 }
  0x28   :  { %v100_v7 = vsel %vm80_vm0, 1, %v217_v6  ;;  %v101_v8 = vsel %vm81_vm1, 1, %v217_v6  ;;  %v88_v9 = vmul.f32 1.5625, %v66_v2  ;;  %v89_v10 = vmul.f32 1.5625, %v67_v3  ;;  %s118_s6 = sshll.u32 %s218_s1, 4  ;;  %s119_s6 = int_to_ptr.vmem [resolvable:$true] %s118_s6 }
  0x29   :  { %v104_v11 = vadd.s32 %v101_v8, %v100_v7  ;;  %vm92_vm2 = vcmp.lt.f32.partialorder %v66_v2, 0.0  ;;  %vm86_vm3 = vcmp.lt.f32.partialorder %v66_v2, %v84_v4  ;;  %vm93_vm6 = vcmp.lt.f32.partialorder %v67_v3, 0.0  ;;  %s185_s7 = scalar_lea.vmem %s119_s6, 256  ;;  %p190_p3 = scmp.lt.s32.totalorder %s119_s6, %s119_s6 }
  0x2a   :  { %vm90_vm4 = vcmp.lt.f32.partialorder %v68_v0, %v88_v9  ;;  %vm91_vm5 = vcmp.lt.f32.partialorder %v69_v1, %v89_v10  ;;  %vm87_vm7 = vcmp.lt.f32.partialorder %v67_v3, %v85_v5  ;;  %p186_p2 = scmp.ne.s32.totalorder %s119_s6, %s185_s7  ;;  %p191_p4 = scmp.lt.s32.totalorder %s185_s7, %s185_s7 }
  0x2b   :  { %vm94_vm8 = vmor %vm90_vm4, %vm92_vm2  ;;  %108 = vst [vmem:[#allocation7] sm:$0xff] %v104_v11 }
  0x2c   :  { %vm95_vm9 = vmor %vm91_vm5, %vm93_vm6  ;;  %p192_p5 = por %p191_p4, %p190_p3 }
  0x2d   :  { %vm96_vm10 = vmand %vm86_vm3, %vm94_vm8 }
  0x2e   :  { %vm97_vm11 = vmand %vm87_vm7, %vm95_vm9  ;;  %p193_p6 = pnand %p192_p5, %p186_p2 }
  0x2f   :  { %vm98_vm12 = vmand %vm80_vm0, %vm96_vm10 }
  0x30   :  { %vm99_vm13 = vmand %vm81_vm1, %vm97_vm11  ;;  %v102_v12 = vsel %vm98_vm12, 1, %v217_v6 }
  0x31   :  { %v103_v13 = vsel %vm99_vm13, 1, %v217_v6 }
  0x32   :  { %v105_v14 = vadd.s32 %v103_v13, %v102_v12 }
  0x34   :  { %112 = vst [vmem:[#allocation7 + $0x8] sm:$0xff] %v105_v14 }
  0x35   :  { %196 = shalt.err (!%p193_p6)
}
  0x36   :  { %s197_s10 = scalar_lea.hbm %s285_s2, 256 }
  0x37   :  { %p198_p7 = scmp.ne.s32.totalorder %s285_s2, %s197_s10  ;;  %p201_p8 = scmp.lt.u32.totalorder %s197_s10, %s285_s2 }
  0x39   :  { %p203_p9 = pnand %p201_p8, %p198_p7 }
  0x3b   :  { %206 = shalt.err (!%p203_p9)
}
  0x3c   :  { %124 = dma.vmem_to_hbm [thread:$0]  %s119_s6, 256, %s285_s2, [#allocation4], %s214_s19, %s214_s19, %s215_s20  }
  0x3d   :  { %211 = dma.done.wait [#allocation4], 256  }
  0x3e   :  { %212 = vsyncadd [#allocation4], 4294967040 }
  0x3f   :  { %128 = vsyncpa [#allocation3], 1 }
  0x40   :  { %129 = vsyncpa [#allocation6], 1 }
  0x41   :  { %130 = vsyncpa [#allocation4], 1 }

</bundles_post_ra>
